<compile_context>
chip_gen: v7x
topology: tpu7x:2x2x1
jax: 0.10.0
libtpu: 0.0.40
codegen_flags: <defaults>
</compile_context>

<pallas_src>
import functools

import jax
import jax.numpy as jnp
from jax import lax
from jax.experimental import pallas as pl
from jax.experimental.pallas import tpu as pltpu


# ------------------------- small helpers (used inside kernels) -------------------------

def _round_up(x, m):
    return (x + m - 1) // m * m


def _sum_all(x):
    # (r, c) -> (1, 1), keeping everything rank-2 inside the kernel.
    return jnp.sum(jnp.sum(x, axis=1, keepdims=True), axis=0, keepdims=True)


def _centered_from_gram(gram, inv_nm2, inv_nm12):
    """Double-centered pairwise-distance matrix (P_Distance_Matrix) from an f32 Gram."""
    n = gram.shape[0]
    ii = lax.broadcasted_iota(jnp.int32, (n, n), 0)
    jj = lax.broadcasted_iota(jnp.int32, (n, n), 1)
    eye = ii == jj
    gd = jnp.where(eye, gram, 0.0)
    sq_col = jnp.sum(gd, axis=1, keepdims=True)       # (n, 1)  ||x_i||^2
    sq_row = jnp.sum(gd, axis=0, keepdims=True)       # (1, n)  ||x_j||^2
    d2 = jnp.maximum(sq_col + sq_row - 2.0 * gram, 0.0)
    a = jnp.sqrt(d2 + 1e-18)
    col = jnp.sum(a, axis=0, keepdims=True)           # (1, n)
    row = jnp.sum(a, axis=1, keepdims=True)           # (n, 1)
    tot = _sum_all(a)                                  # (1, 1)
    A = a - col * inv_nm2 - row * inv_nm2 + tot * inv_nm12
    return jnp.where(eye, 0.0, A)                      # zero the diagonal


# ------------------------- Pallas kernels -------------------------

def _pdist_kernel(x_ref, o_ref, gram_ref, *, inv_nm2, inv_nm12):
    # x_ref: (n, chunk) f32 slice of the latent; gram_ref: (n, n) f32 accumulator.
    k = pl.program_id(0)

    @pl.when(k == 0)
    def _():
        gram_ref[...] = jnp.zeros_like(gram_ref)

    xb = x_ref[...].astype(jnp.bfloat16)
    gram_ref[...] += lax.dot_general(
        xb, xb, (((1,), (1,)), ((), ())), preferred_element_type=jnp.float32)

    @pl.when(k == pl.num_programs(0) - 1)
    def _():
        o_ref[...] = _centered_from_gram(gram_ref[...], inv_nm2, inv_nm12)


def _pdist_embed_kernel(emb_ref, tgt_ref, o_ref, *, inv_nm2, inv_nm12):
    # emb_ref: (num_classes, De) f32 table; tgt_ref: (n, 1) int32; o_ref: (n, n) f32.
    n = o_ref.shape[0]
    nc = emb_ref.shape[0]
    onehot = (lax.broadcasted_iota(jnp.int32, (n, nc), 1) == tgt_ref[...]).astype(jnp.float32)
    latent = jnp.dot(onehot, emb_ref[...], preferred_element_type=jnp.float32)  # exact row gather
    xb = latent.astype(jnp.bfloat16)
    gram = lax.dot_general(
        xb, xb, (((1,), (1,)), ((), ())), preferred_element_type=jnp.float32)
    o_ref[...] = _centered_from_gram(gram, inv_nm2, inv_nm12)


def _loss_combine_kernel(logits_ref, tgt_ref, a_ref, b_ref, g_ref,
                         loss_ref, cls_ref, dc_ref, *, alpha, inv_n, inv_nn3):
    # --- CrossEntropyLoss(outputs, targets), mean reduction ---
    x = logits_ref[...]
    n, k = x.shape
    m = jnp.max(x, axis=1, keepdims=True)
    lse = m + jnp.log(jnp.sum(jnp.exp(x - m), axis=1, keepdims=True))
    cols = lax.broadcasted_iota(jnp.int32, (n, k), 1)
    picked = jnp.sum(jnp.where(cols == tgt_ref[...], x, 0.0), axis=1, keepdims=True)
    cls = _sum_all(lse - picked) * inv_n                          # (1, 1)

    # --- P_removal + Correlation (bracket_op reductions over (n, n) matrices) ---
    A = a_ref[...]
    Bm = b_ref[...]
    G = g_ref[...]
    g_ab = _sum_all(A * Bm) * inv_nn3
    g_bb = _sum_all(Bm * Bm) * inv_nn3
    A_B = A - (g_ab / g_bb) * Bm
    g_xy = _sum_all(A_B * G) * inv_nn3
    g_xx = _sum_all(A_B * A_B) * inv_nn3
    g_yy = _sum_all(G * G) * inv_nn3
    dc = g_xy * lax.rsqrt(g_xx * g_yy + 1e-18)                    # (1, 1)

    cls_ref[...] = cls
    dc_ref[...] = dc
    loss_ref[...] = cls - alpha * dc


# ------------------------- wrappers -------------------------

def p_distance_matrix(latent, *, max_chunk=1024):
    """P_Distance_Matrix(latent) with the feature dim streamed through VMEM."""
    latent = latent.astype(jnp.float32)
    n, d = latent.shape
    assert n > 3, "P_DC centering/bracket terms need batch > 3"
    d_pad = _round_up(d, 128)
    chunk = min(d_pad, _round_up(max_chunk, 128))
    d_pad = _round_up(d_pad, chunk)
    if d_pad != d:
        latent = jnp.pad(latent, ((0, 0), (0, d_pad - d)))   # zero pad: distances unchanged
    n_steps = d_pad // chunk
    kernel = functools.partial(_pdist_kernel,
                               inv_nm2=1.0 / (n - 2),
                               inv_nm12=1.0 / ((n - 1) * (n - 2)))
    return pl.pallas_call(
        kernel,
        out_shape=jax.ShapeDtypeStruct((n, n), jnp.float32),
        grid=(n_steps,),
        in_specs=[pl.BlockSpec((n, chunk), lambda k: (0, k))],
        out_specs=pl.BlockSpec((n, n), lambda k: (0, 0)),
        scratch_shapes=[pltpu.VMEM((n, n), jnp.float32)],
        compiler_params=pltpu.CompilerParams(dimension_semantics=("arbitrary",)),
    )(latent)


def p_distance_matrix_from_embedding(embedding, targets):
    """P_Distance_Matrix(embedding[targets]) with the gather fused into the kernel."""
    n = targets.shape[0]
    assert n > 3
    tgt2 = targets.astype(jnp.int32).reshape(n, 1)
    kernel = functools.partial(_pdist_embed_kernel,
                               inv_nm2=1.0 / (n - 2),
                               inv_nm12=1.0 / ((n - 1) * (n - 2)))
    return pl.pallas_call(
        kernel,
        out_shape=jax.ShapeDtypeStruct((n, n), jnp.float32),
    )(embedding.astype(jnp.float32), tgt2)


def loss_dc_forward(outputs, featuresX, featuresY, targets, label_embedding, alpha=0.1):
    """Pallas implementation of Loss_DC.forward -> (loss, cls_loss, dc_loss)."""
    n = outputs.shape[0]
    assert n > 3
    matrix_A = p_distance_matrix(featuresX)
    matrix_B = p_distance_matrix(featuresY)
    matrix_GT = p_distance_matrix_from_embedding(label_embedding, targets)

    kernel = functools.partial(_loss_combine_kernel, alpha=float(alpha),
                               inv_n=1.0 / n, inv_nn3=1.0 / (n * (n - 3)))
    loss, cls, dc = pl.pallas_call(
        kernel,
        out_shape=(jax.ShapeDtypeStruct((1, 1), jnp.float32),
                   jax.ShapeDtypeStruct((1, 1), jnp.float32),
                   jax.ShapeDtypeStruct((1, 1), jnp.float32)),
    )(outputs.astype(jnp.float32),
      targets.astype(jnp.int32).reshape(n, 1),
      matrix_A, matrix_B, matrix_GT)
    return loss[0, 0], cls[0, 0], dc[0, 0]


# ------------------------- pure-JAX reference (for self-check) -------------------------

def _reference(outputs, featuresX, featuresY, targets, label_embedding, alpha=0.1):
    def pdist(latent):
        n = latent.shape[0]
        a = jnp.sqrt(jnp.sum(jnp.square(latent[None, :, :] - latent[:, None, :]), axis=-1) + 1e-18)
        A = (a - jnp.sum(a, axis=0, keepdims=True) / (n - 2)
               - jnp.sum(a, axis=1, keepdims=True) / (n - 2)
               + jnp.sum(a) / ((n - 1) * (n - 2)))
        return A - jnp.diag(jnp.diag(A))

    def bracket(MA, MB):
        n = MA.shape[0]
        return jnp.sum(MA * MB) / (n * (n - 3))

    n = outputs.shape[0]
    logp = jax.nn.log_softmax(outputs, axis=-1)
    cls = -jnp.mean(logp[jnp.arange(n), targets])
    gt = label_embedding[targets]
    mA, mB, mG = pdist(featuresX), pdist(featuresY), pdist(gt)
    mAB = mA - bracket(mA, mB) / bracket(mB, mB) * mB
    dc = bracket(mAB, mG) / jnp.sqrt(bracket(mAB, mAB) * bracket(mG, mG) + 1e-18)
    loss = cls - alpha * dc
    return loss, cls, dc


# ------------------------- main -------------------------

if __name__ == "__main__":
    B, NUM_CLASSES = 8, 32           # B > 3 required by the (n-2), n(n-3) terms
    DX, DY, DE = 2048, 1024, 300
    ALPHA = 0.1

    key = jax.random.PRNGKey(0)
    k_log, k_fx, k_fy, k_tgt, k_emb = jax.random.split(key, 5)

    # TODO(synk): ImageNetLabelEmbedding is torch.load('ImageNet_Class_Embedding.pt') in the
    # original module; no checkpoint is available, so a deterministic random table is used.
    label_embedding = jax.random.normal(k_emb, (NUM_CLASSES, DE), dtype=jnp.float32)

    targets = jax.random.randint(k_tgt, (B,), 0, NUM_CLASSES)
    outputs = jax.random.normal(k_log, (B, NUM_CLASSES), dtype=jnp.float32)

    gt = label_embedding[targets]
    featuresX = jax.random.normal(k_fx, (B, DX), dtype=jnp.float32)
    featuresX = featuresX.at[:, :DE].add(0.5 * gt)   # mild correlation with GT -> non-trivial dc_loss
    featuresY = jax.random.normal(k_fy, (B, DY), dtype=jnp.float32)

    fwd = jax.jit(functools.partial(loss_dc_forward, alpha=ALPHA))
    loss, cls_loss, dc_loss = fwd(outputs, featuresX, featuresY, targets, label_embedding)
    loss = jax.block_until_ready(loss)

    ref_loss, ref_cls, ref_dc = _reference(outputs, featuresX, featuresY, targets,
                                           label_embedding, alpha=ALPHA)

    got = jnp.stack([loss, cls_loss, dc_loss])
    want = jnp.stack([ref_loss, ref_cls, ref_dc])
    assert got.shape == (3,) and got.dtype == jnp.float32
    assert jnp.allclose(got, want, rtol=2e-2, atol=2e-2), (got, want)

    print("KERNEL_OK")
</pallas_src>

<mosaic_0001>
module attributes {stable_mosaic.version = 11 : i64} {
  func.func @_pdist_kernel(%arg0: i32, %arg1: memref<8x1024xf32, #tpu.memory_space<vmem>>, %arg2: memref<8x8xf32, #tpu.memory_space<vmem>>, %arg3: memref<8x8xf32, #tpu.memory_space<vmem>>) attributes {dimension_semantics = [#tpu.dimension_semantics<arbitrary>], iteration_bounds = array<i64: 2>, scalar_prefetch = 0 : i64, scratch_operands = 1 : i64, tpu.core_type = #tpu.core_type<tc>, window_params = [{transform_indices = @transform_0, window_bounds = array<i64: 8, 1024>}, {pipeline_mode = #tpu.pipeline_mode<synchronous>, transform_indices = @transform_1, window_bounds = array<i64: 8, 8>}]} {
    %c0_i32 = arith.constant 0 : i32
    %0 = arith.cmpi eq, %arg0, %c0_i32 : i32
    %1 = arith.extui %0 : i1 to i32
    %c0_i32_0 = arith.constant 0 : i32
    %2 = arith.cmpi ne, %1, %c0_i32_0 : i32
    scf.if %2 {
      %cst_7 = arith.constant 0.000000e+00 : f32
      %12 = vector.broadcast %cst_7 : f32 to vector<8x8xf32>
      %c0_8 = arith.constant 0 : index
      %c0_9 = arith.constant 0 : index
      %13 = vector.load %arg3[%c0_8, %c0_9] : memref<8x8xf32, #tpu.memory_space<vmem>>, vector<8x8xf32>
      tpu.vector_store %arg3[%c0_8, %c0_9], %12 {strides = array<i32>} : memref<8x8xf32, #tpu.memory_space<vmem>>, vector<8x8xf32>,
    } else {
    }
    %c0 = arith.constant 0 : index
    %c0_1 = arith.constant 0 : index
    %3 = vector.load %arg1[%c0, %c0_1] : memref<8x1024xf32, #tpu.memory_space<vmem>>, vector<8x1024xf32>
    %4 = arith.truncf %3 : vector<8x1024xf32> to vector<8x1024xbf16>
    %c0_2 = arith.constant 0 : index
    %c0_3 = arith.constant 0 : index
    %5 = vector.load %arg3[%c0_2, %c0_3] : memref<8x8xf32, #tpu.memory_space<vmem>>, vector<8x8xf32>
    %cst = arith.constant dense<0.000000e+00> : vector<8x8xf32>
    %6 = tpu.matmul %4, %4, %cst {dimension_numbers = #tpu.dot_dimension_numbers<[1], [1], [0], [0], [0, 0, 1, 0], [], []>} : vector<8x1024xbf16>, vector<8x1024xbf16>, vector<8x8xf32> -> vector<8x8xf32>
    %7 = arith.addf %5, %6 : vector<8x8xf32>
    %c0_4 = arith.constant 0 : index
    %c0_5 = arith.constant 0 : index
    %8 = vector.load %arg3[%c0_4, %c0_5] : memref<8x8xf32, #tpu.memory_space<vmem>>, vector<8x8xf32>
    tpu.vector_store %arg3[%c0_4, %c0_5], %7 {strides = array<i32>} : memref<8x8xf32, #tpu.memory_space<vmem>>, vector<8x8xf32>,
    %c1_i32 = arith.constant 1 : i32
    %9 = arith.cmpi eq, %arg0, %c1_i32 : i32
    %10 = arith.extui %9 : i1 to i32
    %c0_i32_6 = arith.constant 0 : i32
    %11 = arith.cmpi ne, %10, %c0_i32_6 : i32
    scf.if %11 {
      %c0_7 = arith.constant 0 : index
      %c0_8 = arith.constant 0 : index
      %12 = vector.load %arg3[%c0_7, %c0_8] : memref<8x8xf32, #tpu.memory_space<vmem>>, vector<8x8xf32>
      %13 = tpu.iota {dimensions = array<i32: 0>} : vector<8x8xi32>
      %14 = tpu.iota {dimensions = array<i32: 1>} : vector<8x8xi32>
      %15 = arith.cmpi eq, %13, %14 : vector<8x8xi32>
      %cst_9 = arith.constant 0.000000e+00 : f32
      %16 = vector.broadcast %cst_9 : f32 to vector<8x8xf32>
      %17 = arith.select %15, %12, %16 : vector<8x8xi1>, vector<8x8xf32>
      %cst_10 = arith.constant dense<0.000000e+00> : vector<8xf32>
      %18 = vector.multi_reduction <add>, %17, %cst_10 [1] : vector<8x8xf32> to vector<8xf32>
      %19 = vector.shape_cast %18 : vector<8xf32> to vector<8x1xf32>
      %cst_11 = arith.constant dense<0.000000e+00> : vector<8xf32>
      %20 = vector.multi_reduction <add>, %17, %cst_11 [0] : vector<8x8xf32> to vector<8xf32>
      %21 = vector.shape_cast %20 : vector<8xf32> to vector<1x8xf32>
      %22 = vector.broadcast %19 : vector<8x1xf32> to vector<8x8xf32>
      %23 = vector.broadcast %21 : vector<1x8xf32> to vector<8x8xf32>
      %24 = arith.addf %22, %23 : vector<8x8xf32>
      %cst_12 = arith.constant 2.000000e+00 : f32
      %25 = vector.broadcast %cst_12 : f32 to vector<8x8xf32>
      %26 = arith.mulf %25, %12 : vector<8x8xf32>
      %27 = arith.subf %24, %26 : vector<8x8xf32>
      %cst_13 = arith.constant 0.000000e+00 : f32
      %28 = vector.broadcast %cst_13 : f32 to vector<8x8xf32>
      %29 = arith.maximumf %27, %28 : vector<8x8xf32>
      %cst_14 = arith.constant 1.000000e-18 : f32
      %30 = vector.broadcast %cst_14 : f32 to vector<8x8xf32>
      %31 = arith.addf %29, %30 : vector<8x8xf32>
      %32 = math.sqrt %31 : vector<8x8xf32>
      %cst_15 = arith.constant dense<0.000000e+00> : vector<8xf32>
      %33 = vector.multi_reduction <add>, %32, %cst_15 [0] : vector<8x8xf32> to vector<8xf32>
      %34 = vector.shape_cast %33 : vector<8xf32> to vector<1x8xf32>
      %cst_16 = arith.constant dense<0.000000e+00> : vector<8xf32>
      %35 = vector.multi_reduction <add>, %32, %cst_16 [1] : vector<8x8xf32> to vector<8xf32>
      %36 = vector.shape_cast %35 : vector<8xf32> to vector<8x1xf32>
      %cst_17 = arith.constant dense<0.000000e+00> : vector<8xf32>
      %37 = vector.multi_reduction <add>, %32, %cst_17 [1] : vector<8x8xf32> to vector<8xf32>
      %38 = vector.shape_cast %37 : vector<8xf32> to vector<8x1xf32>
      %cst_18 = arith.constant dense<0.000000e+00> : vector<1xf32>
      %39 = vector.multi_reduction <add>, %38, %cst_18 [0] : vector<8x1xf32> to vector<1xf32>
      %40 = vector.shape_cast %39 : vector<1xf32> to vector<1x1xf32>
      %cst_19 = arith.constant 0.166666672 : f32
      %41 = vector.broadcast %cst_19 : f32 to vector<1x8xf32>
      %42 = arith.mulf %34, %41 : vector<1x8xf32>
      %43 = vector.broadcast %42 : vector<1x8xf32> to vector<8x8xf32>
      %44 = arith.subf %32, %43 : vector<8x8xf32>
      %cst_20 = arith.constant 0.166666672 : f32
      %45 = vector.broadcast %cst_20 : f32 to vector<8x1xf32>
      %46 = arith.mulf %36, %45 : vector<8x1xf32>
      %47 = vector.broadcast %46 : vector<8x1xf32> to vector<8x8xf32>
      %48 = arith.subf %44, %47 : vector<8x8xf32>
      %cst_21 = arith.constant 0.0238095243 : f32
      %49 = vector.broadcast %cst_21 : f32 to vector<1x1xf32>
      %50 = arith.mulf %40, %49 : vector<1x1xf32>
      %51 = vector.broadcast %50 : vector<1x1xf32> to vector<8x8xf32>
      %52 = arith.addf %48, %51 : vector<8x8xf32>
      %cst_22 = arith.constant 0.000000e+00 : f32
      %53 = vector.broadcast %cst_22 : f32 to vector<8x8xf32>
      %54 = arith.select %15, %53, %52 : vector<8x8xi1>, vector<8x8xf32>
      %c0_23 = arith.constant 0 : index
      %c0_24 = arith.constant 0 : index
      %55 = vector.load %arg2[%c0_23, %c0_24] : memref<8x8xf32, #tpu.memory_space<vmem>>, vector<8x8xf32>
      tpu.vector_store %arg2[%c0_23, %c0_24], %54 {strides = array<i32>} : memref<8x8xf32, #tpu.memory_space<vmem>>, vector<8x8xf32>,
    } else {
    }
    return
  }
  func.func @transform_0(%arg0: i32) -> (i32, i32) {
    %c0_i32 = arith.constant 0 : i32
    %c0_i32_0 = arith.constant 0 : i32
    return %c0_i32, %arg0 : i32, i32
  }
  func.func @transform_1(%arg0: i32) -> (i32, i32) {
    %c0_i32 = arith.constant 0 : i32
    %c0_i32_0 = arith.constant 0 : i32
    %c0_i32_1 = arith.constant 0 : i32
    return %c0_i32, %c0_i32_0 : i32, i32
  }
}

module attributes {stable_mosaic.version = 11 : i64} {
  func.func @_pdist_embed_kernel(%arg0: memref<32x300xf32, #tpu.memory_space<vmem>>, %arg1: memref<8x1xi32, #tpu.memory_space<vmem>>, %arg2: memref<8x8xf32, #tpu.memory_space<vmem>>) attributes {dimension_semantics = [], scalar_prefetch = 0 : i64, scratch_operands = 0 : i64, tpu.core_type = #tpu.core_type<tc>} {
    %0 = tpu.iota {dimensions = array<i32: 1>} : vector<8x32xi32>
    %c0 = arith.constant 0 : index
    %c0_0 = arith.constant 0 : index
    %1 = vector.load %arg1[%c0, %c0_0] : memref<8x1xi32, #tpu.memory_space<vmem>>, vector<8x1xi32>
    %2 = vector.broadcast %1 : vector<8x1xi32> to vector<8x32xi32>
    %3 = arith.cmpi eq, %0, %2 : vector<8x32xi32>
    %4 = arith.extui %3 : vector<8x32xi1> to vector<8x32xi32>
    %5 = arith.sitofp %4 : vector<8x32xi32> to vector<8x32xf32>
    %c0_1 = arith.constant 0 : index
    %c0_2 = arith.constant 0 : index
    %6 = vector.load %arg0[%c0_1, %c0_2] : memref<32x300xf32, #tpu.memory_space<vmem>>, vector<32x300xf32>
    %cst = arith.constant dense<0.000000e+00> : vector<8x300xf32>
    %7 = tpu.matmul %5, %6, %cst {dimension_numbers = #tpu.dot_dimension_numbers<[1], [0], [0], [1], [0, 0, 1, 1], [], []>} : vector<8x32xf32>, vector<32x300xf32>, vector<8x300xf32> -> vector<8x300xf32>
    %8 = arith.truncf %7 : vector<8x300xf32> to vector<8x300xbf16>
    %cst_3 = arith.constant dense<0.000000e+00> : vector<8x8xf32>
    %9 = tpu.matmul %8, %8, %cst_3 {dimension_numbers = #tpu.dot_dimension_numbers<[1], [1], [0], [0], [0, 0, 1, 0], [], []>} : vector<8x300xbf16>, vector<8x300xbf16>, vector<8x8xf32> -> vector<8x8xf32>
    %10 = tpu.iota {dimensions = array<i32: 0>} : vector<8x8xi32>
    %11 = tpu.iota {dimensions = array<i32: 1>} : vector<8x8xi32>
    %12 = arith.cmpi eq, %10, %11 : vector<8x8xi32>
    %cst_4 = arith.constant 0.000000e+00 : f32
    %13 = vector.broadcast %cst_4 : f32 to vector<8x8xf32>
    %14 = arith.select %12, %9, %13 : vector<8x8xi1>, vector<8x8xf32>
    %cst_5 = arith.constant dense<0.000000e+00> : vector<8xf32>
    %15 = vector.multi_reduction <add>, %14, %cst_5 [1] : vector<8x8xf32> to vector<8xf32>
    %16 = vector.shape_cast %15 : vector<8xf32> to vector<8x1xf32>
    %cst_6 = arith.constant dense<0.000000e+00> : vector<8xf32>
    %17 = vector.multi_reduction <add>, %14, %cst_6 [0] : vector<8x8xf32> to vector<8xf32>
    %18 = vector.shape_cast %17 : vector<8xf32> to vector<1x8xf32>
    %19 = vector.broadcast %16 : vector<8x1xf32> to vector<8x8xf32>
    %20 = vector.broadcast %18 : vector<1x8xf32> to vector<8x8xf32>
    %21 = arith.addf %19, %20 : vector<8x8xf32>
    %cst_7 = arith.constant 2.000000e+00 : f32
    %22 = vector.broadcast %cst_7 : f32 to vector<8x8xf32>
    %23 = arith.mulf %22, %9 : vector<8x8xf32>
    %24 = arith.subf %21, %23 : vector<8x8xf32>
    %cst_8 = arith.constant 0.000000e+00 : f32
    %25 = vector.broadcast %cst_8 : f32 to vector<8x8xf32>
    %26 = arith.maximumf %24, %25 : vector<8x8xf32>
    %cst_9 = arith.constant 1.000000e-18 : f32
    %27 = vector.broadcast %cst_9 : f32 to vector<8x8xf32>
    %28 = arith.addf %26, %27 : vector<8x8xf32>
    %29 = math.sqrt %28 : vector<8x8xf32>
    %cst_10 = arith.constant dense<0.000000e+00> : vector<8xf32>
    %30 = vector.multi_reduction <add>, %29, %cst_10 [0] : vector<8x8xf32> to vector<8xf32>
    %31 = vector.shape_cast %30 : vector<8xf32> to vector<1x8xf32>
    %cst_11 = arith.constant dense<0.000000e+00> : vector<8xf32>
    %32 = vector.multi_reduction <add>, %29, %cst_11 [1] : vector<8x8xf32> to vector<8xf32>
    %33 = vector.shape_cast %32 : vector<8xf32> to vector<8x1xf32>
    %cst_12 = arith.constant dense<0.000000e+00> : vector<8xf32>
    %34 = vector.multi_reduction <add>, %29, %cst_12 [1] : vector<8x8xf32> to vector<8xf32>
    %35 = vector.shape_cast %34 : vector<8xf32> to vector<8x1xf32>
    %cst_13 = arith.constant dense<0.000000e+00> : vector<1xf32>
    %36 = vector.multi_reduction <add>, %35, %cst_13 [0] : vector<8x1xf32> to vector<1xf32>
    %37 = vector.shape_cast %36 : vector<1xf32> to vector<1x1xf32>
    %cst_14 = arith.constant 0.166666672 : f32
    %38 = vector.broadcast %cst_14 : f32 to vector<1x8xf32>
    %39 = arith.mulf %31, %38 : vector<1x8xf32>
    %40 = vector.broadcast %39 : vector<1x8xf32> to vector<8x8xf32>
    %41 = arith.subf %29, %40 : vector<8x8xf32>
    %cst_15 = arith.constant 0.166666672 : f32
    %42 = vector.broadcast %cst_15 : f32 to vector<8x1xf32>
    %43 = arith.mulf %33, %42 : vector<8x1xf32>
    %44 = vector.broadcast %43 : vector<8x1xf32> to vector<8x8xf32>
    %45 = arith.subf %41, %44 : vector<8x8xf32>
    %cst_16 = arith.constant 0.0238095243 : f32
    %46 = vector.broadcast %cst_16 : f32 to vector<1x1xf32>
    %47 = arith.mulf %37, %46 : vector<1x1xf32>
    %48 = vector.broadcast %47 : vector<1x1xf32> to vector<8x8xf32>
    %49 = arith.addf %45, %48 : vector<8x8xf32>
    %cst_17 = arith.constant 0.000000e+00 : f32
    %50 = vector.broadcast %cst_17 : f32 to vector<8x8xf32>
    %51 = arith.select %12, %50, %49 : vector<8x8xi1>, vector<8x8xf32>
    %c0_18 = arith.constant 0 : index
    %c0_19 = arith.constant 0 : index
    %52 = vector.load %arg2[%c0_18, %c0_19] : memref<8x8xf32, #tpu.memory_space<vmem>>, vector<8x8xf32>
    tpu.vector_store %arg2[%c0_18, %c0_19], %51 {strides = array<i32>} : memref<8x8xf32, #tpu.memory_space<vmem>>, vector<8x8xf32>,
    return
  }
}

module attributes {stable_mosaic.version = 11 : i64} {
  func.func @_pdist_kernel(%arg0: i32, %arg1: memref<8x1024xf32, #tpu.memory_space<vmem>>, %arg2: memref<8x8xf32, #tpu.memory_space<vmem>>, %arg3: memref<8x8xf32, #tpu.memory_space<vmem>>) attributes {dimension_semantics = [#tpu.dimension_semantics<arbitrary>], iteration_bounds = array<i64: 1>, scalar_prefetch = 0 : i64, scratch_operands = 1 : i64, tpu.core_type = #tpu.core_type<tc>, window_params = [{transform_indices = @transform_0, window_bounds = array<i64: 8, 1024>}, {pipeline_mode = #tpu.pipeline_mode<synchronous>, transform_indices = @transform_1, window_bounds = array<i64: 8, 8>}]} {
    %c0_i32 = arith.constant 0 : i32
    %0 = arith.cmpi eq, %arg0, %c0_i32 : i32
    %1 = arith.extui %0 : i1 to i32
    %c0_i32_0 = arith.constant 0 : i32
    %2 = arith.cmpi ne, %1, %c0_i32_0 : i32
    scf.if %2 {
      %cst_8 = arith.constant 0.000000e+00 : f32
      %12 = vector.broadcast %cst_8 : f32 to vector<8x8xf32>
      %c0_9 = arith.constant 0 : index
      %c0_10 = arith.constant 0 : index
      %13 = vector.load %arg3[%c0_9, %c0_10] : memref<8x8xf32, #tpu.memory_space<vmem>>, vector<8x8xf32>
      tpu.vector_store %arg3[%c0_9, %c0_10], %12 {strides = array<i32>} : memref<8x8xf32, #tpu.memory_space<vmem>>, vector<8x8xf32>,
    } else {
    }
    %c0 = arith.constant 0 : index
    %c0_1 = arith.constant 0 : index
    %3 = vector.load %arg1[%c0, %c0_1] : memref<8x1024xf32, #tpu.memory_space<vmem>>, vector<8x1024xf32>
    %4 = arith.truncf %3 : vector<8x1024xf32> to vector<8x1024xbf16>
    %c0_2 = arith.constant 0 : index
    %c0_3 = arith.constant 0 : index
    %5 = vector.load %arg3[%c0_2, %c0_3] : memref<8x8xf32, #tpu.memory_space<vmem>>, vector<8x8xf32>
    %cst = arith.constant dense<0.000000e+00> : vector<8x8xf32>
    %6 = tpu.matmul %4, %4, %cst {dimension_numbers = #tpu.dot_dimension_numbers<[1], [1], [0], [0], [0, 0, 1, 0], [], []>} : vector<8x1024xbf16>, vector<8x1024xbf16>, vector<8x8xf32> -> vector<8x8xf32>
    %7 = arith.addf %5, %6 : vector<8x8xf32>
    %c0_4 = arith.constant 0 : index
    %c0_5 = arith.constant 0 : index
    %8 = vector.load %arg3[%c0_4, %c0_5] : memref<8x8xf32, #tpu.memory_space<vmem>>, vector<8x8xf32>
    tpu.vector_store %arg3[%c0_4, %c0_5], %7 {strides = array<i32>} : memref<8x8xf32, #tpu.memory_space<vmem>>, vector<8x8xf32>,
    %c0_i32_6 = arith.constant 0 : i32
    %9 = arith.cmpi eq, %arg0, %c0_i32_6 : i32
    %10 = arith.extui %9 : i1 to i32
    %c0_i32_7 = arith.constant 0 : i32
    %11 = arith.cmpi ne, %10, %c0_i32_7 : i32
    scf.if %11 {
      %c0_8 = arith.constant 0 : index
      %c0_9 = arith.constant 0 : index
      %12 = vector.load %arg3[%c0_8, %c0_9] : memref<8x8xf32, #tpu.memory_space<vmem>>, vector<8x8xf32>
      %13 = tpu.iota {dimensions = array<i32: 0>} : vector<8x8xi32>
      %14 = tpu.iota {dimensions = array<i32: 1>} : vector<8x8xi32>
      %15 = arith.cmpi eq, %13, %14 : vector<8x8xi32>
      %cst_10 = arith.constant 0.000000e+00 : f32
      %16 = vector.broadcast %cst_10 : f32 to vector<8x8xf32>
      %17 = arith.select %15, %12, %16 : vector<8x8xi1>, vector<8x8xf32>
      %cst_11 = arith.constant dense<0.000000e+00> : vector<8xf32>
      %18 = vector.multi_reduction <add>, %17, %cst_11 [1] : vector<8x8xf32> to vector<8xf32>
      %19 = vector.shape_cast %18 : vector<8xf32> to vector<8x1xf32>
      %cst_12 = arith.constant dense<0.000000e+00> : vector<8xf32>
      %20 = vector.multi_reduction <add>, %17, %cst_12 [0] : vector<8x8xf32> to vector<8xf32>
      %21 = vector.shape_cast %20 : vector<8xf32> to vector<1x8xf32>
      %22 = vector.broadcast %19 : vector<8x1xf32> to vector<8x8xf32>
      %23 = vector.broadcast %21 : vector<1x8xf32> to vector<8x8xf32>
      %24 = arith.addf %22, %23 : vector<8x8xf32>
      %cst_13 = arith.constant 2.000000e+00 : f32
      %25 = vector.broadcast %cst_13 : f32 to vector<8x8xf32>
      %26 = arith.mulf %25, %12 : vector<8x8xf32>
      %27 = arith.subf %24, %26 : vector<8x8xf32>
      %cst_14 = arith.constant 0.000000e+00 : f32
      %28 = vector.broadcast %cst_14 : f32 to vector<8x8xf32>
      %29 = arith.maximumf %27, %28 : vector<8x8xf32>
      %cst_15 = arith.constant 1.000000e-18 : f32
      %30 = vector.broadcast %cst_15 : f32 to vector<8x8xf32>
      %31 = arith.addf %29, %30 : vector<8x8xf32>
      %32 = math.sqrt %31 : vector<8x8xf32>
      %cst_16 = arith.constant dense<0.000000e+00> : vector<8xf32>
      %33 = vector.multi_reduction <add>, %32, %cst_16 [0] : vector<8x8xf32> to vector<8xf32>
      %34 = vector.shape_cast %33 : vector<8xf32> to vector<1x8xf32>
      %cst_17 = arith.constant dense<0.000000e+00> : vector<8xf32>
      %35 = vector.multi_reduction <add>, %32, %cst_17 [1] : vector<8x8xf32> to vector<8xf32>
      %36 = vector.shape_cast %35 : vector<8xf32> to vector<8x1xf32>
      %cst_18 = arith.constant dense<0.000000e+00> : vector<8xf32>
      %37 = vector.multi_reduction <add>, %32, %cst_18 [1] : vector<8x8xf32> to vector<8xf32>
      %38 = vector.shape_cast %37 : vector<8xf32> to vector<8x1xf32>
      %cst_19 = arith.constant dense<0.000000e+00> : vector<1xf32>
      %39 = vector.multi_reduction <add>, %38, %cst_19 [0] : vector<8x1xf32> to vector<1xf32>
      %40 = vector.shape_cast %39 : vector<1xf32> to vector<1x1xf32>
      %cst_20 = arith.constant 0.166666672 : f32
      %41 = vector.broadcast %cst_20 : f32 to vector<1x8xf32>
      %42 = arith.mulf %34, %41 : vector<1x8xf32>
      %43 = vector.broadcast %42 : vector<1x8xf32> to vector<8x8xf32>
      %44 = arith.subf %32, %43 : vector<8x8xf32>
      %cst_21 = arith.constant 0.166666672 : f32
      %45 = vector.broadcast %cst_21 : f32 to vector<8x1xf32>
      %46 = arith.mulf %36, %45 : vector<8x1xf32>
      %47 = vector.broadcast %46 : vector<8x1xf32> to vector<8x8xf32>
      %48 = arith.subf %44, %47 : vector<8x8xf32>
      %cst_22 = arith.constant 0.0238095243 : f32
      %49 = vector.broadcast %cst_22 : f32 to vector<1x1xf32>
      %50 = arith.mulf %40, %49 : vector<1x1xf32>
      %51 = vector.broadcast %50 : vector<1x1xf32> to vector<8x8xf32>
      %52 = arith.addf %48, %51 : vector<8x8xf32>
      %cst_23 = arith.constant 0.000000e+00 : f32
      %53 = vector.broadcast %cst_23 : f32 to vector<8x8xf32>
      %54 = arith.select %15, %53, %52 : vector<8x8xi1>, vector<8x8xf32>
      %c0_24 = arith.constant 0 : index
      %c0_25 = arith.constant 0 : index
      %55 = vector.load %arg2[%c0_24, %c0_25] : memref<8x8xf32, #tpu.memory_space<vmem>>, vector<8x8xf32>
      tpu.vector_store %arg2[%c0_24, %c0_25], %54 {strides = array<i32>} : memref<8x8xf32, #tpu.memory_space<vmem>>, vector<8x8xf32>,
    } else {
    }
    return
  }
  func.func @transform_0(%arg0: i32) -> (i32, i32) {
    %c0_i32 = arith.constant 0 : i32
    %c0_i32_0 = arith.constant 0 : i32
    return %c0_i32, %arg0 : i32, i32
  }
  func.func @transform_1(%arg0: i32) -> (i32, i32) {
    %c0_i32 = arith.constant 0 : i32
    %c0_i32_0 = arith.constant 0 : i32
    %c0_i32_1 = arith.constant 0 : i32
    return %c0_i32, %c0_i32_0 : i32, i32
  }
}

module attributes {stable_mosaic.version = 11 : i64} {
  func.func @_loss_combine_kernel(%arg0: memref<8x32xf32, #tpu.memory_space<vmem>>, %arg1: memref<8x1xi32, #tpu.memory_space<vmem>>, %arg2: memref<8x8xf32, #tpu.memory_space<vmem>>, %arg3: memref<8x8xf32, #tpu.memory_space<vmem>>, %arg4: memref<8x8xf32, #tpu.memory_space<vmem>>, %arg5: memref<1x1xf32, #tpu.memory_space<vmem>>, %arg6: memref<1x1xf32, #tpu.memory_space<vmem>>, %arg7: memref<1x1xf32, #tpu.memory_space<vmem>>) attributes {dimension_semantics = [], scalar_prefetch = 0 : i64, scratch_operands = 0 : i64, tpu.core_type = #tpu.core_type<tc>} {
    %c0 = arith.constant 0 : index
    %c0_0 = arith.constant 0 : index
    %0 = vector.load %arg0[%c0, %c0_0] : memref<8x32xf32, #tpu.memory_space<vmem>>, vector<8x32xf32>
    %cst = arith.constant dense<0xFF800000> : vector<8xf32>
    %1 = vector.multi_reduction <maximumf>, %0, %cst [1] : vector<8x32xf32> to vector<8xf32>
    %2 = vector.shape_cast %1 : vector<8xf32> to vector<8x1xf32>
    %3 = vector.broadcast %2 : vector<8x1xf32> to vector<8x32xf32>
    %4 = arith.subf %0, %3 : vector<8x32xf32>
    %5 = math.exp %4 : vector<8x32xf32>
    %cst_1 = arith.constant dense<0.000000e+00> : vector<8xf32>
    %6 = vector.multi_reduction <add>, %5, %cst_1 [1] : vector<8x32xf32> to vector<8xf32>
    %7 = vector.shape_cast %6 : vector<8xf32> to vector<8x1xf32>
    %8 = math.log %7 : vector<8x1xf32>
    %9 = arith.addf %2, %8 : vector<8x1xf32>
    %10 = tpu.iota {dimensions = array<i32: 1>} : vector<8x32xi32>
    %c0_2 = arith.constant 0 : index
    %c0_3 = arith.constant 0 : index
    %11 = vector.load %arg1[%c0_2, %c0_3] : memref<8x1xi32, #tpu.memory_space<vmem>>, vector<8x1xi32>
    %12 = vector.broadcast %11 : vector<8x1xi32> to vector<8x32xi32>
    %13 = arith.cmpi eq, %10, %12 : vector<8x32xi32>
    %cst_4 = arith.constant 0.000000e+00 : f32
    %14 = vector.broadcast %cst_4 : f32 to vector<8x32xf32>
    %15 = arith.select %13, %0, %14 : vector<8x32xi1>, vector<8x32xf32>
    %cst_5 = arith.constant dense<0.000000e+00> : vector<8xf32>
    %16 = vector.multi_reduction <add>, %15, %cst_5 [1] : vector<8x32xf32> to vector<8xf32>
    %17 = vector.shape_cast %16 : vector<8xf32> to vector<8x1xf32>
    %18 = arith.subf %9, %17 : vector<8x1xf32>
    %cst_6 = arith.constant dense<0.000000e+00> : vector<8xf32>
    %19 = vector.multi_reduction <add>, %18, %cst_6 [1] : vector<8x1xf32> to vector<8xf32>
    %20 = vector.shape_cast %19 : vector<8xf32> to vector<8x1xf32>
    %cst_7 = arith.constant dense<0.000000e+00> : vector<1xf32>
    %21 = vector.multi_reduction <add>, %20, %cst_7 [0] : vector<8x1xf32> to vector<1xf32>
    %22 = vector.shape_cast %21 : vector<1xf32> to vector<1x1xf32>
    %cst_8 = arith.constant 1.250000e-01 : f32
    %23 = vector.broadcast %cst_8 : f32 to vector<1x1xf32>
    %24 = arith.mulf %22, %23 : vector<1x1xf32>
    %c0_9 = arith.constant 0 : index
    %c0_10 = arith.constant 0 : index
    %25 = vector.load %arg2[%c0_9, %c0_10] : memref<8x8xf32, #tpu.memory_space<vmem>>, vector<8x8xf32>
    %c0_11 = arith.constant 0 : index
    %c0_12 = arith.constant 0 : index
    %26 = vector.load %arg3[%c0_11, %c0_12] : memref<8x8xf32, #tpu.memory_space<vmem>>, vector<8x8xf32>
    %c0_13 = arith.constant 0 : index
    %c0_14 = arith.constant 0 : index
    %27 = vector.load %arg4[%c0_13, %c0_14] : memref<8x8xf32, #tpu.memory_space<vmem>>, vector<8x8xf32>
    %28 = arith.mulf %25, %26 : vector<8x8xf32>
    %cst_15 = arith.constant dense<0.000000e+00> : vector<8xf32>
    %29 = vector.multi_reduction <add>, %28, %cst_15 [1] : vector<8x8xf32> to vector<8xf32>
    %30 = vector.shape_cast %29 : vector<8xf32> to vector<8x1xf32>
    %cst_16 = arith.constant dense<0.000000e+00> : vector<1xf32>
    %31 = vector.multi_reduction <add>, %30, %cst_16 [0] : vector<8x1xf32> to vector<1xf32>
    %32 = vector.shape_cast %31 : vector<1xf32> to vector<1x1xf32>
    %cst_17 = arith.constant 2.500000e-02 : f32
    %33 = vector.broadcast %cst_17 : f32 to vector<1x1xf32>
    %34 = arith.mulf %32, %33 : vector<1x1xf32>
    %35 = arith.mulf %26, %26 : vector<8x8xf32>
    %cst_18 = arith.constant dense<0.000000e+00> : vector<8xf32>
    %36 = vector.multi_reduction <add>, %35, %cst_18 [1] : vector<8x8xf32> to vector<8xf32>
    %37 = vector.shape_cast %36 : vector<8xf32> to vector<8x1xf32>
    %cst_19 = arith.constant dense<0.000000e+00> : vector<1xf32>
    %38 = vector.multi_reduction <add>, %37, %cst_19 [0] : vector<8x1xf32> to vector<1xf32>
    %39 = vector.shape_cast %38 : vector<1xf32> to vector<1x1xf32>
    %cst_20 = arith.constant 2.500000e-02 : f32
    %40 = vector.broadcast %cst_20 : f32 to vector<1x1xf32>
    %41 = arith.mulf %39, %40 : vector<1x1xf32>
    %42 = arith.divf %34, %41 : vector<1x1xf32>
    %43 = vector.broadcast %42 : vector<1x1xf32> to vector<8x8xf32>
    %44 = arith.mulf %43, %26 : vector<8x8xf32>
    %45 = arith.subf %25, %44 : vector<8x8xf32>
    %46 = arith.mulf %45, %27 : vector<8x8xf32>
    %cst_21 = arith.constant dense<0.000000e+00> : vector<8xf32>
    %47 = vector.multi_reduction <add>, %46, %cst_21 [1] : vector<8x8xf32> to vector<8xf32>
    %48 = vector.shape_cast %47 : vector<8xf32> to vector<8x1xf32>
    %cst_22 = arith.constant dense<0.000000e+00> : vector<1xf32>
    %49 = vector.multi_reduction <add>, %48, %cst_22 [0] : vector<8x1xf32> to vector<1xf32>
    %50 = vector.shape_cast %49 : vector<1xf32> to vector<1x1xf32>
    %cst_23 = arith.constant 2.500000e-02 : f32
    %51 = vector.broadcast %cst_23 : f32 to vector<1x1xf32>
    %52 = arith.mulf %50, %51 : vector<1x1xf32>
    %53 = arith.mulf %45, %45 : vector<8x8xf32>
    %cst_24 = arith.constant dense<0.000000e+00> : vector<8xf32>
    %54 = vector.multi_reduction <add>, %53, %cst_24 [1] : vector<8x8xf32> to vector<8xf32>
    %55 = vector.shape_cast %54 : vector<8xf32> to vector<8x1xf32>
    %cst_25 = arith.constant dense<0.000000e+00> : vector<1xf32>
    %56 = vector.multi_reduction <add>, %55, %cst_25 [0] : vector<8x1xf32> to vector<1xf32>
    %57 = vector.shape_cast %56 : vector<1xf32> to vector<1x1xf32>
    %cst_26 = arith.constant 2.500000e-02 : f32
    %58 = vector.broadcast %cst_26 : f32 to vector<1x1xf32>
    %59 = arith.mulf %57, %58 : vector<1x1xf32>
    %60 = arith.mulf %27, %27 : vector<8x8xf32>
    %cst_27 = arith.constant dense<0.000000e+00> : vector<8xf32>
    %61 = vector.multi_reduction <add>, %60, %cst_27 [1] : vector<8x8xf32> to vector<8xf32>
    %62 = vector.shape_cast %61 : vector<8xf32> to vector<8x1xf32>
    %cst_28 = arith.constant dense<0.000000e+00> : vector<1xf32>
    %63 = vector.multi_reduction <add>, %62, %cst_28 [0] : vector<8x1xf32> to vector<1xf32>
    %64 = vector.shape_cast %63 : vector<1xf32> to vector<1x1xf32>
    %cst_29 = arith.constant 2.500000e-02 : f32
    %65 = vector.broadcast %cst_29 : f32 to vector<1x1xf32>
    %66 = arith.mulf %64, %65 : vector<1x1xf32>
    %67 = arith.mulf %59, %66 : vector<1x1xf32>
    %cst_30 = arith.constant 1.000000e-18 : f32
    %68 = vector.broadcast %cst_30 : f32 to vector<1x1xf32>
    %69 = arith.addf %67, %68 : vector<1x1xf32>
    %70 = math.rsqrt %69 : vector<1x1xf32>
    %71 = arith.mulf %52, %70 : vector<1x1xf32>
    %c0_31 = arith.constant 0 : index
    %c0_32 = arith.constant 0 : index
    %72 = vector.load %arg6[%c0_31, %c0_32] : memref<1x1xf32, #tpu.memory_space<vmem>>, vector<1x1xf32>
    tpu.vector_store %arg6[%c0_31, %c0_32], %24 {strides = array<i32>} : memref<1x1xf32, #tpu.memory_space<vmem>>, vector<1x1xf32>,
    %c0_33 = arith.constant 0 : index
    %c0_34 = arith.constant 0 : index
    %73 = vector.load %arg7[%c0_33, %c0_34] : memref<1x1xf32, #tpu.memory_space<vmem>>, vector<1x1xf32>
    tpu.vector_store %arg7[%c0_33, %c0_34], %71 {strides = array<i32>} : memref<1x1xf32, #tpu.memory_space<vmem>>, vector<1x1xf32>,
    %cst_35 = arith.constant 1.000000e-01 : f32
    %74 = vector.broadcast %cst_35 : f32 to vector<1x1xf32>
    %75 = arith.mulf %74, %71 : vector<1x1xf32>
    %76 = arith.subf %24, %75 : vector<1x1xf32>
    %c0_36 = arith.constant 0 : index
    %c0_37 = arith.constant 0 : index
    %77 = vector.load %arg5[%c0_36, %c0_37] : memref<1x1xf32, #tpu.memory_space<vmem>>, vector<1x1xf32>
    tpu.vector_store %arg5[%c0_36, %c0_37], %76 {strides = array<i32>} : memref<1x1xf32, #tpu.memory_space<vmem>>, vector<1x1xf32>,
    return
  }
}

</mosaic_0001>

<bundles_post_ra>
// kernel: loss_dc_forward.5
= control target key start
LH: loop header
LB: loop body
LE: loop exit
PB: predicated region body
PF: predicated region fallthrough
CT: control target
= control target key end

     0   :  { %vm13_vm0 = vcmask 64512   ;;  %v256_v16 = vmov 0.0   ;;  %v199_v37 = vlaneseq  ;;  %s301_s0 = inlined_call_operand.vmem [shape: f32[8,1024], index: 0, kind: input, shape index: {}]   ;;  %s302_s1 = inlined_call_operand.vmem [shape: f32[8,8], index: 1, kind: output, shape index: {}]  }
   0x1   :  { %v16_v0 = vld [vmem:[%s301_s0 + $0x8] sm:$0xff]  ;;  %v18_v1 = vld [vmem:[%s301_s0 + $0x18] sm:$0xff]  ;;  %v15_v2 = vld [vmem:[%s301_s0] sm:$0xff]  ;;  %14 = vst.msk [vmem:[#allocation2] sm:$0xff] %vm13_vm0, %v256_v16 }
   0x2   :  { %v24_v3 = vpack.c.bf16 %v16_v0, %v16_v0  ;;  %v26_v4 = vpack.c.bf16 %v18_v1, %v18_v1  ;;  %v23_v5 = vpack.c.bf16 %v15_v2, %v15_v2  ;;  %v17_v6 = vld [vmem:[%s301_s0 + $0x10] sm:$0xff]  ;;  %v20_v7 = vld [vmem:[%s301_s0 + $0x28] sm:$0xff]  ;;  %v22_v8 = vld [vmem:[%s301_s0 + $0x38] sm:$0xff]  ;;  %v200_v39 = vshrl.u32 %v199_v37, 7 }
   0x3   :  { %v25_v9 = vpack.c.bf16 %v17_v6, %v17_v6  ;;  %v28_v10 = vpack.c.bf16 %v20_v7, %v20_v7  ;;  %v30_v11 = vpack.c.bf16 %v22_v8, %v22_v8  ;;  %v19_v12 = vld [vmem:[%s301_s0 + $0x20] sm:$0xff]  ;;  %v21_v13 = vld [vmem:[%s301_s0 + $0x30] sm:$0xff]  ;;  %v202_v40 = vand.u32 127, %v199_v37 }
   0x4   :  { %32 = vmatprep.subr.bf16.mxu0 %v24_v3  ;;  %72 = vmatprep.subr.bf16.mxu1 %v26_v4  ;;  %v27_v14 = vpack.c.bf16 %v19_v12, %v19_v12  ;;  %v29_v15 = vpack.c.bf16 %v21_v13, %v21_v13 }
   0x5   :  { %33 = vmatpush1.bf16.xpose.msra.mxu0 %v23_v5  ;;  %73 = vmatpush1.bf16.xpose.msra.mxu1 %v25_v9  ;;  %vm203_vm1 = vcmp.eq.s32.totalorder %v200_v39, %v202_v40 }
   0x6   :  { %64 = vmatprep.mubr.bf16.mxu0 %v24_v3  ;;  %104 = vmatprep.mubr.bf16.mxu1 %v26_v4 }
   0x7   :  { %112 = vmatprep.subr.bf16.mxu0 %v28_v10  ;;  %152 = vmatprep.subr.bf16.mxu1 %v30_v11 }
   0x8   :  { %v31_v31 = vld [vmem:[#allocation2] sm:$0xff] }
   0xc   :  { %65 = vmatmul.mubr.bf16.vlgmr.msra.gmra.mrb[0].mxu0 %v23_v5  ;;  %105 = vmatmul.mubr.bf16.vlgmr.msra.gmra.mrb[0].mxu1 %v25_v9 }
   0xd   :  { %113 = vmatpush1.bf16.xpose.msra.mxu0 %v27_v14  ;;  %153 = vmatpush1.bf16.xpose.msra.mxu1 %v29_v15 }
   0xe   :  { %144 = vmatprep.mubr.bf16.mxu0 %v28_v10  ;;  %184 = vmatprep.mubr.bf16.mxu1 %v30_v11 }
  0x14   :  { %145 = vmatmul.mubr.bf16.vlgmr.msra.gmra.mrb[4].mxu0 %v27_v14  ;;  %185 = vmatmul.mubr.bf16.vlgmr.msra.gmra.mrb[4].mxu1 %v29_v15 }
  0xdf   :  { %v66_v17 = vpop.f32.mrb[0].mxu0  ;;  %v106_v18 = vpop.f32.mrb[0].mxu1 }
  0xe0   :  { %v107_v19 = vadd.f32 %v106_v18, %v66_v17  ;;  %v68_v20 = vpop.f32.mrb[1].mxu0  ;;  %v108_v21 = vpop.f32.mrb[1].mxu1 }
  0xe1   :  { %v69_v22 = vpop.f32.mrb[2].mxu0  ;;  %v109_v23 = vpop.f32.mrb[2].mxu1 }
  0xe2   :  { %v70_v24 = vpop.f32.mrb[3].mxu0  ;;  %v110_v25 = vpop.f32.mrb[3].mxu1 }
  0xe7   :  { %v146_v26 = vpop.f32.mrb[4].mxu0  ;;  %v186_v27 = vpop.f32.mrb[4].mxu1 }
  0xe8   :  { %v147_v28 = vadd.f32 %v146_v26, %v107_v19  ;;  %v148_v29 = vpop.f32.mrb[5].mxu0  ;;  %v188_v30 = vpop.f32.mrb[5].mxu1 }
  0xe9   :  { %v149_v32 = vpop.f32.mrb[6].mxu0  ;;  %v189_v33 = vpop.f32.mrb[6].mxu1 }
  0xea   :  { %v187_v34 = vadd.f32 %v186_v27, %v147_v28  ;;  %v150_v35 = vpop.f32.mrb[7].mxu0  ;;  %v190_v36 = vpop.f32.mrb[7].mxu1 }
  0xec   :  { %v192_v38 = vadd.f32 %v187_v34, %v31_v31 }
  0xee   :  { %194 = vst.msk [vmem:[#allocation2] sm:$0xff] %vm13_vm0, %v192_v38 }
  0xf5   :  { %v198_v41 = vld [vmem:[#allocation2] sm:$0xff] }
  0xf6   :  { %v204_v42 = vsel %vm203_vm1, %v198_v41, 0.0  ;;  %v215_v51 = vmul.f32 2.0, %v198_v41 }
  0xf7   :  { %v205_v43 = vsel %vm13_vm0, %v204_v42, 0.0 }
  0xf8   :  { %206 = vadd.xlane.f32.xlu0 %v205_v43  ;;  %v208_v44 = vrot.slane %v205_v43, 4 }
  0xfa   :  { %v209_v45 = vadd.f32 %v208_v44, %v205_v43 }
  0xfc   :  { %v210_v46 = vrot.slane %v209_v45, 2 }
  0xfe   :  { %v211_v47 = vadd.f32 %v210_v46, %v209_v45 }
 0x100   :  { %v212_v48 = vrot.slane %v211_v47, 1 }
 0x102   :  { %v213_v49 = vadd.f32 %v212_v48, %v211_v47 }
 0x185   :  { %v207_v50 = vpop.xlane.xlu0 %206 }
 0x186   :  { %v214_v52 = vadd.f32 %v213_v49, %v207_v50 }
 0x188   :  { %v216_v53 = vsub.f32 %v214_v52, %v215_v51 }
 0x18a   :  { %v217_v54 = vmax.f32 %v216_v53, 0.0 }
 0x18c   :  { %v218_v55 = vadd.f32 1e-18, %v217_v54 }
 0x18e   :  { %254 = vrsqrt.f32 %v218_v55  ;;  %vm221_vm2 = vcmp.eq.f32.partialorder %v218_v55, inf  ;;  %v224_v58 = vand.u32 2147483648, %v218_v55  ;;  %vm223_vm3 = vcmp.eq.f32.partialorder %v218_v55, 0.0 }
 0x198   :  { %v255_v56 = vpop.eup %254 }
 0x199   :  { %v220_v57 = vmul.f32 %v255_v56, %v218_v55 }
 0x19b   :  { %v222_v59 = vsel %vm221_vm2, %v218_v55, %v220_v57 }
 0x19c   :  { %v225_v60 = vsel %vm223_vm3, %v224_v58, %v222_v59 }
 0x19d   :  { %v226_v61 = vsel %vm13_vm0, %v225_v60, 0.0 }
 0x19e   :  { %233 = vadd.xlane.f32.xlu0 %v226_v61  ;;  %v227_v62 = vrot.slane %v226_v61, 4 }
 0x1a0   :  { %v228_v63 = vadd.f32 %v227_v62, %v226_v61 }
 0x1a2   :  { %v229_v0 = vrot.slane %v228_v63, 2 }
 0x1a4   :  { %v230_v1 = vadd.f32 %v229_v0, %v228_v63 }
 0x1a6   :  { %v231_v2 = vrot.slane %v230_v1, 1 }
 0x1a8   :  { %v232_v3 = vadd.f32 %v231_v2, %v230_v1 }
 0x1aa   :  { %v241_v4 = vmul.f32 0.16666667, %v232_v3 }
 0x1ac   :  { %v242_v5 = vsub.f32 %v225_v60, %v241_v4 }
 0x22b   :  { %v234_v6 = vpop.xlane.xlu0 %233 }
 0x22c   :  { %v235_v7 = vrot.slane %v234_v6, 4  ;;  %v243_v12 = vmul.f32 0.16666667, %v234_v6 }
 0x22e   :  { %v236_v8 = vadd.f32 %v235_v7, %v234_v6  ;;  %v244_v14 = vsub.f32 %v242_v5, %v243_v12 }
 0x230   :  { %v237_v9 = vrot.slane %v236_v8, 2 }
 0x232   :  { %v238_v10 = vadd.f32 %v237_v9, %v236_v8 }
 0x234   :  { %v239_v11 = vrot.slane %v238_v10, 1 }
 0x236   :  { %v240_v13 = vadd.f32 %v239_v11, %v238_v10 }
 0x238   :  { %v245_v15 = vmul.f32 0.023809524, %v240_v13 }
 0x23a   :  { %v246_v16 = vadd.f32 %v245_v15, %v244_v14 }
 0x23c   :  { %v247_v17 = vsel %vm203_vm1, 0.0, %v246_v16 }
 0x23d   :  { %248 = vst.msk [vmem:[%s302_s1] sm:$0xff] %vm13_vm0, %v247_v17 }

// kernel: loss_dc_forward.6
= control target key start
LH: loop header
LB: loop body
LE: loop exit
PB: predicated region body
PF: predicated region fallthrough
CT: control target
= control target key end

     0   :  { %7 = vsyncpa [#allocation3], 0  ;;  %s413_s9 = smov [#allocation2]   ;;  %s466_s0 = inlined_call_operand.hbm [shape: f32[32,300], index: 0, kind: input, shape index: {}]   ;;  %s467_s1 = inlined_call_operand.vmem [shape: s32[8,1], index: 1, kind: input, shape index: {}]   ;;  %s468_s2 = inlined_call_operand.vmem [shape: f32[8,8], index: 2, kind: output, shape index: {}]  }
   0x1   :  { %s13_s10 = sshll.u32 %s413_s9, 4  ;;  %s389_s13 = scalar_lea.hbm %s466_s0, 1536  ;;  %s14_s10 = int_to_ptr.vmem [resolvable:$true] %s13_s10 }
   0x2   :  { %p390_p0 = scmp.ne.s32.totalorder %s466_s0, %s389_s13  ;;  %p393_p1 = scmp.lt.u32.totalorder %s389_s13, %s466_s0 }
   0x4   :  { %p395_p2 = pnand %p393_p1, %p390_p0 }
   0x6   :  { %398 = shalt.err (!%p395_p2)
}
   0x7   :  { %s399_s18 = scalar_lea.vmem %s14_s10, 1536  ;;  %p404_p4 = scmp.lt.s32.totalorder %s14_s10, %s14_s10 }
   0x8   :  { %p400_p3 = scmp.ne.s32.totalorder %s14_s10, %s399_s18  ;;  %p405_p5 = scmp.lt.s32.totalorder %s399_s18, %s399_s18 }
   0xa   :  { %p406_p6 = por %p405_p5, %p404_p4 }
   0xc   :  { %p407_p7 = pnand %p406_p6, %p400_p3 }
   0xe   :  { %410 = shalt.err (!%p407_p7)
}
   0xf   :  { %s414_s19 = smov 384   ;;  %s415_s20 = smov 24  }
  0x10   :  { %19 = dma.hbm_to_vmem [thread:$0]  %s466_s0, 1536, %s14_s10, [#allocation3], %s414_s19, %s414_s19, %s415_s20  }
  0x11   :  { %411 = dma.done.wait [#allocation3], 1536  }
  0x12   :  { %412 = vsyncadd [#allocation3], 4294965760  ;;  %v416_v0 = vmov 0   ;;  %v417_v1 = vmov 0.0   ;;  %v28_v2 = vld [vmem:[%s467_s1] sm:$0xff]  ;;  %v36_v3 = vld [vmem:[#allocation2 + $0x8] sm:$0xff]  ;;  %v26_v16 = vlaneseq }
  0x13   :  { %386 = vset.pattern.permute.xlu0 %v416_v0  ;;  %115 = vmatprep.mubr.f32.mxu1 %v417_v1  ;;  %v39_v4 = vld [vmem:[#allocation2 + $0x20] sm:$0xff]  ;;  %v38_v7 = vld [vmem:[#allocation2 + $0x18] sm:$0xff]  ;;  %v45_v10 = vld [vmem:[#allocation2 + $0x50] sm:$0xff]  ;;  %v418_v15 = vmov 0.0|0.0   ;;  %vm47_vm0 = vcmask 261120   ;;  %vm419_vm2 = vmmov 0  }
  0x14   :  { %30 = vperm.xlu0 %386, %v28_v2   ;;  %v361_v5 = vpack.c.bf16 %v39_v4, %v36_v3  ;;  %v35_v6 = vld [vmem:[#allocation2] sm:$0xff]  ;;  %v42_v8 = vld [vmem:[#allocation2 + $0x38] sm:$0xff]  ;;  %v41_v11 = vld [vmem:[#allocation2 + $0x30] sm:$0xff]  ;;  %v450_v17 = vand.u32 127, %v26_v16  ;;  %vm195_vm3 = vcmask 359424   ;;  %v280_v34 = vshrl.u32 %v26_v16, 7 }
  0x15   :  { %v363_v9 = vpack.c.bf16 %v38_v7, %v35_v6  ;;  %v44_v12 = vld [vmem:[#allocation2 + $0x48] sm:$0xff]  ;;  %v365_v13 = vpack.c.bf16 %v45_v10, %v42_v8  ;;  %v37_v18 = vld [vmem:[#allocation2 + $0x10] sm:$0xff]  ;;  %v43_v22 = vld [vmem:[#allocation2 + $0x40] sm:$0xff]  ;;  %vm283_vm5 = vcmask 64512  }
  0x16   :  { %362 = vmatprep.subr.bf16.mxu1 %v361_v5  ;;  %v367_v14 = vpack.c.bf16 %v44_v12, %v41_v11  ;;  %v40_v19 = vld [vmem:[#allocation2 + $0x28] sm:$0xff]  ;;  %v46_v23 = vld [vmem:[#allocation2 + $0x58] sm:$0xff]  ;;  %vm281_vm4 = vcmp.eq.s32.totalorder %v280_v34, %v450_v17 }
  0x17   :  { %364 = vmatpush1.bf16.msra.mxu1 %v363_v9  ;;  %v370_v21 = vpack.c.bf16 %v40_v19, %v37_v18  ;;  %v373_v25 = vpack.c.bf16 %v46_v23, %v43_v22 }
  0x18   :  { %366 = vmatprep.subr.bf16.mxu1 %v365_v13 }
  0x1b   :  { %368 = vmatpush1.bf16.msra.mxu1 %v367_v14 }
  0x1c   :  { %369 = vmatprep.subr.bf16.mxu1 %v418_v15 }
  0x93   :  { %v31_v20 = vpop.permute.xlu0 %30 }
  0x94   :  { %vm32_vm1 = vcmp.eq.s32.totalorder %v450_v17, %v31_v20 }
  0x95   :  { %v333_v24 = vsel %vm32_vm1, 1.0, %v417_v1 }
  0x96   :  { %334 = vmatmul.mubr.msk.f32.vlgmr.msra.gmra.mrb[0].mxu1 %vm47_vm0, %v333_v24 }
  0x97   :  { %371 = vmatpush3.bf16.msra.mxu1 %v370_v21  ;;  %352 = vmatprep.mubr.msk.f32.mxu1 %vm419_vm2, %v417_v1 }
  0x98   :  { %372 = vmatprep.subr.bf16.mxu1 %v418_v15 }
  0x9b   :  { %374 = vmatpush3.bf16.msra.mxu1 %v373_v25 }
  0x9e   :  { %353 = vmatmul.mubr.msk.f32.vlgmr.msra.gmra.mrb[2].mxu1 %vm47_vm0, %v333_v24 }
 0x169   :  { %v117_v26 = vpop.f32.mrb[0].mxu1 }
 0x16a   :  { %v119_v27 = vpop.f32.mrb[1].mxu1  ;;  %v192_v29 = vpack.c.bf16 %v117_v26, %v117_v26 }
 0x16b   :  { %v193_v28 = vpack.c.bf16 %v119_v27, %v119_v27 }
 0x16d   :  { %199 = vmatprep.subr.bf16.mxu0 %v193_v28  ;;  %231 = vmatprep.mubr.bf16.mxu0 %v193_v28 }
 0x16e   :  { %200 = vmatpush1.bf16.xpose.msra.mxu0 %v192_v29 }
 0x16f   :  { %355 = vmatprep.subr.bf16.mxu0 %v417_v1 }
 0x171   :  { %v188_v30 = vpop.f32.mrb[2].mxu1 }
 0x172   :  { %v194_v31 = vpack.c.bf16 %v188_v30, %v188_v30  ;;  %v354_v32 = vpop.f32.mrb[3].mxu1 }
 0x174   :  { %v197_v33 = vsel %vm195_vm3, %v194_v31, 0 }
 0x175   :  { %232 = vmatmul.mubr.bf16.vlgmr.msra.gmra.mrb[0].mxu0 %v192_v29 }
 0x176   :  { %356 = vmatpush3.bf16.xpose.msra.mxu0 %v197_v33  ;;  %357 = vmatprep.mubr.msk.bf16.mxu0 %vm419_vm2, %v417_v1 }
 0x181   :  { %358 = vmatmul.mubr.msk.bf16.vlgmr.msra.gmra.mrb[0].mxu0 %vm195_vm3, %v194_v31 }
 0x254   :  { %v273_v35 = vpop.f32.mrb[0].mxu0 }
 0x255   :  { %v282_v36 = vsel %vm281_vm4, %v273_v35, 0.0  ;;  %v359_v37 = vpop.f32.mrb[1].mxu0  ;;  %v294_v48 = vmul.f32 2.0, %v273_v35 }
 0x256   :  { %v276_v38 = vpop.f32.mrb[2].mxu0  ;;  %v284_v39 = vsel %vm283_vm5, %v282_v36, 0.0 }
 0x257   :  { %285 = vadd.xlane.f32.xlu0 %v284_v39  ;;  %v360_v40 = vpop.f32.mrb[3].mxu0  ;;  %v287_v41 = vrot.slane %v284_v39, 4 }
 0x259   :  { %v288_v42 = vadd.f32 %v287_v41, %v284_v39 }
 0x25b   :  { %v289_v43 = vrot.slane %v288_v42, 2 }
 0x25d   :  { %v290_v44 = vadd.f32 %v289_v43, %v288_v42 }
 0x25f   :  { %v291_v45 = vrot.slane %v290_v44, 1 }
 0x261   :  { %v292_v46 = vadd.f32 %v291_v45, %v290_v44 }
 0x2e4   :  { %v286_v47 = vpop.xlane.xlu0 %285 }
 0x2e5   :  { %v293_v49 = vadd.f32 %v292_v46, %v286_v47 }
 0x2e7   :  { %v295_v50 = vsub.f32 %v293_v49, %v294_v48 }
 0x2e9   :  { %v296_v51 = vmax.f32 %v295_v50, 0.0 }
 0x2eb   :  { %v297_v52 = vadd.f32 1e-18, %v296_v51 }
 0x2ed   :  { %387 = vrsqrt.f32 %v297_v52  ;;  %vm300_vm6 = vcmp.eq.f32.partialorder %v297_v52, inf  ;;  %v303_v55 = vand.u32 2147483648, %v297_v52  ;;  %vm302_vm7 = vcmp.eq.f32.partialorder %v297_v52, 0.0 }
 0x2f7   :  { %v388_v53 = vpop.eup %387 }
 0x2f8   :  { %v299_v54 = vmul.f32 %v388_v53, %v297_v52 }
 0x2fa   :  { %v301_v56 = vsel %vm300_vm6, %v297_v52, %v299_v54 }
 0x2fb   :  { %v304_v57 = vsel %vm302_vm7, %v303_v55, %v301_v56 }
 0x2fc   :  { %v305_v58 = vsel %vm283_vm5, %v304_v57, 0.0 }
 0x2fd   :  { %312 = vadd.xlane.f32.xlu1 %v305_v58  ;;  %v306_v59 = vrot.slane %v305_v58, 4 }
 0x2ff   :  { %v307_v60 = vadd.f32 %v306_v59, %v305_v58 }
 0x301   :  { %v308_v61 = vrot.slane %v307_v60, 2 }
 0x303   :  { %v309_v62 = vadd.f32 %v308_v61, %v307_v60 }
 0x305   :  { %v310_v63 = vrot.slane %v309_v62, 1 }
 0x307   :  { %v311_v0 = vadd.f32 %v310_v63, %v309_v62 }
 0x309   :  { %v320_v1 = vmul.f32 0.16666667, %v311_v0 }
 0x30b   :  { %v321_v2 = vsub.f32 %v304_v57, %v320_v1 }
 0x38a   :  { %v313_v3 = vpop.xlane.xlu1 %312 }
 0x38b   :  { %v314_v4 = vrot.slane %v313_v3, 4  ;;  %v322_v9 = vmul.f32 0.16666667, %v313_v3 }
 0x38d   :  { %v315_v5 = vadd.f32 %v314_v4, %v313_v3  ;;  %v323_v11 = vsub.f32 %v321_v2, %v322_v9 }
 0x38f   :  { %v316_v6 = vrot.slane %v315_v5, 2 }
 0x391   :  { %v317_v7 = vadd.f32 %v316_v6, %v315_v5 }
 0x393   :  { %v318_v8 = vrot.slane %v317_v7, 1 }
 0x395   :  { %v319_v10 = vadd.f32 %v318_v8, %v317_v7 }
 0x397   :  { %v324_v12 = vmul.f32 0.023809524, %v319_v10 }
 0x399   :  { %v325_v13 = vadd.f32 %v324_v12, %v323_v11 }
 0x39b   :  { %v326_v14 = vsel %vm281_vm4, 0.0, %v325_v13 }
 0x39c   :  { %327 = vst.msk [vmem:[%s468_s2] sm:$0xff] %vm283_vm5, %v326_v14 }
 0x39d   :  { %332 = vsyncpa [#allocation3], 1 }

// kernel: loss_dc_forward.4
= control target key start
LH: loop header
LB: loop body
LE: loop exit
PB: predicated region body
PF: predicated region fallthrough
CT: control target
= control target key end

     0   :  { %s414_s6 = smov 0   ;;  %s442_s0 = inlined_call_operand.vmem [shape: f32[8,2048], index: 0, kind: input, shape index: {}]   ;;  %s443_s1 = inlined_call_operand.vmem [shape: f32[8,8], index: 1, kind: output, shape index: {}]  }
   0x1 LB: > { %s420_s7 = sadd.s32 4294967295, %s401_s6   ;;  %p377_p0 = scmp.ge.s32.totalorder %s401_s6, 1  ;;  %s401_s6 = sphi %s414_s6, %s11_s6  }
   0x2   : > { %p83_p1 = scmp.lt.s32.totalorder %s401_s6, 3 }
   0x4   : > { %p84_p2 = pnand %p377_p0, %p83_p1 }
   0x5   : > { %s378_s8 = sshll.u32 (!%p84_p2), %s420_s7, 3  ;;  %p380_p4 = scmp.ne.s32.totalorder (!%p84_p2), %s420_s7, 0 }
   0x6   : > { %87 = sbr.rel (%p84_p2) target bundleno = 593 (0x251), region = 24  ;;  %p99_p3 = scmp.lt.s32.totalorder (!%p84_p2), %s378_s8, 15 }
   0xd   : > { %s445_s8 = smov (!%p99_p3, %s378_s8), 15  ;;  %108 = sbr.rel (%p380_p4) target bundleno = 20 (0x14), region = 28 }
   0xe   : > { %s379_s9 = sshll.u32 %s445_s8, 3  ;;  %vm109_vm0 = vcmask (!%p380_p4), 64512   ;;  %v403_v0 = vmov (!%p380_p4), 0.0  }
   0xf   : > { %s102_s12 = scalar_lea.vmem %s442_s0, %s379_s9  ;;  %110 = vst.msk [vmem:[#allocation2] sm:$0xff] (!%p380_p4), %vm109_vm0, %v403_v0 }
  0x14 PF: > { %v112_v1 = vld [vmem:[%s102_s12 + $0x8] sm:$0xff]  ;;  %v114_v2 = vld [vmem:[%s102_s12 + $0x18] sm:$0xff]  ;;  %v111_v3 = vld [vmem:[%s102_s12] sm:$0xff]  ;;  %vm289_vm1 = vcmask 64512   ;;  %p381_p5 = scmp.ne.s32.totalorder %s420_s7, 1 }
  0x15   : > { %v120_v4 = vpack.c.bf16 %v112_v1, %v112_v1  ;;  %v122_v5 = vpack.c.bf16 %v114_v2, %v114_v2  ;;  %v119_v6 = vpack.c.bf16 %v111_v3, %v111_v3  ;;  %v113_v7 = vld [vmem:[%s102_s12 + $0x10] sm:$0xff]  ;;  %v116_v8 = vld [vmem:[%s102_s12 + $0x28] sm:$0xff]  ;;  %v118_v9 = vld [vmem:[%s102_s12 + $0x38] sm:$0xff]  ;;  %v296_v38 = vlaneseq (!%p381_p5) }
  0x16   : > { %v121_v10 = vpack.c.bf16 %v113_v7, %v113_v7  ;;  %v124_v11 = vpack.c.bf16 %v116_v8, %v116_v8  ;;  %v126_v12 = vpack.c.bf16 %v118_v9, %v118_v9  ;;  %v115_v13 = vld [vmem:[%s102_s12 + $0x20] sm:$0xff]  ;;  %v117_v14 = vld [vmem:[%s102_s12 + $0x30] sm:$0xff] }
  0x17   : > { %128 = vmatprep.subr.bf16.mxu0 %v120_v4  ;;  %168 = vmatprep.subr.bf16.mxu1 %v122_v5  ;;  %v123_v15 = vpack.c.bf16 %v115_v13, %v115_v13  ;;  %v125_v16 = vpack.c.bf16 %v117_v14, %v117_v14  ;;  %v127_v31 = vld [vmem:[#allocation2] sm:$0xff]  ;;  %v297_v40 = vshrl.u32 (!%p381_p5), %v296_v38, 7  ;;  %v299_v41 = vand.u32 (!%p381_p5), 127, %v296_v38 }
  0x18   : > { %129 = vmatpush1.bf16.xpose.msra.mxu0 %v119_v6  ;;  %169 = vmatpush1.bf16.xpose.msra.mxu1 %v121_v10 }
  0x19   : > { %160 = vmatprep.mubr.bf16.mxu0 %v120_v4  ;;  %200 = vmatprep.mubr.bf16.mxu1 %v122_v5  ;;  %vm300_vm2 = vcmp.eq.s32.totalorder (!%p381_p5), %v297_v40, %v299_v41 }
  0x1a   : > { %208 = vmatprep.subr.bf16.mxu0 %v124_v11  ;;  %248 = vmatprep.subr.bf16.mxu1 %v126_v12 }
  0x1f   : > { %161 = vmatmul.mubr.bf16.vlgmr.msra.gmra.mrb[0].mxu0 %v119_v6  ;;  %201 = vmatmul.mubr.bf16.vlgmr.msra.gmra.mrb[0].mxu1 %v121_v10 }
  0x20   : > { %209 = vmatpush1.bf16.xpose.msra.mxu0 %v123_v15  ;;  %249 = vmatpush1.bf16.xpose.msra.mxu1 %v125_v16 }
  0x21   : > { %240 = vmatprep.mubr.bf16.mxu0 %v124_v11  ;;  %280 = vmatprep.mubr.bf16.mxu1 %v126_v12 }
  0x27   : > { %241 = vmatmul.mubr.bf16.vlgmr.msra.gmra.mrb[4].mxu0 %v123_v15  ;;  %281 = vmatmul.mubr.bf16.vlgmr.msra.gmra.mrb[4].mxu1 %v125_v16 }
  0xf2   : > { %v162_v17 = vpop.f32.mrb[0].mxu0  ;;  %v202_v18 = vpop.f32.mrb[0].mxu1 }
  0xf3   : > { %v203_v19 = vadd.f32 %v202_v18, %v162_v17  ;;  %v164_v20 = vpop.f32.mrb[1].mxu0  ;;  %v204_v21 = vpop.f32.mrb[1].mxu1 }
  0xf4   : > { %v165_v22 = vpop.f32.mrb[2].mxu0  ;;  %v205_v23 = vpop.f32.mrb[2].mxu1 }
  0xf5   : > { %v166_v24 = vpop.f32.mrb[3].mxu0  ;;  %v206_v25 = vpop.f32.mrb[3].mxu1 }
  0xfa   : > { %v242_v26 = vpop.f32.mrb[4].mxu0  ;;  %v282_v27 = vpop.f32.mrb[4].mxu1 }
  0xfb   : > { %v243_v28 = vadd.f32 %v242_v26, %v203_v19  ;;  %v244_v29 = vpop.f32.mrb[5].mxu0  ;;  %v284_v30 = vpop.f32.mrb[5].mxu1  ;;  %294 = sbr.rel (%p381_p5) target bundleno = 593 (0x251), region = 32 }
  0xfc   : > { %v245_v32 = vpop.f32.mrb[6].mxu0  ;;  %v285_v33 = vpop.f32.mrb[6].mxu1 }
  0xfd   : > { %v283_v34 = vadd.f32 %v282_v27, %v243_v28  ;;  %v246_v35 = vpop.f32.mrb[7].mxu0  ;;  %v286_v36 = vpop.f32.mrb[7].mxu1 }
  0xff   : > { %v288_v37 = vadd.f32 %v283_v34, %v127_v31 }
 0x101   : > { %290 = vst.msk [vmem:[#allocation2] sm:$0xff] %vm289_vm1, %v288_v37 }
 0x108   : > { %v295_v39 = vld [vmem:[#allocation2] sm:$0xff] }
 0x109   : > { %v301_v42 = vsel %vm300_vm2, %v295_v39, 0.0  ;;  %v312_v50 = vmul.f32 2.0, %v295_v39 }
 0x10a   : > { %v302_v43 = vsel %vm289_vm1, %v301_v42, 0.0 }
 0x10b   : > { %303 = vadd.xlane.f32.xlu0 %v302_v43  ;;  %v305_v44 = vrot.slane %v302_v43, 4 }
 0x10d   : > { %v306_v45 = vadd.f32 %v305_v44, %v302_v43 }
 0x10f   : > { %v307_v46 = vrot.slane %v306_v45, 2 }
 0x111   : > { %v308_v47 = vadd.f32 %v307_v46, %v306_v45 }
 0x113   : > { %v309_v48 = vrot.slane %v308_v47, 1 }
 0x115   : > { %v310_v49 = vadd.f32 %v309_v48, %v308_v47 }
 0x198   : > { %v304_v51 = vpop.xlane.xlu0 %303 }
 0x199   : > { %v311_v52 = vadd.f32 %v310_v49, %v304_v51 }
 0x19b   : > { %v313_v53 = vsub.f32 %v311_v52, %v312_v50 }
 0x19d   : > { %v314_v54 = vmax.f32 %v313_v53, 0.0 }
 0x19f   : > { %v315_v55 = vadd.f32 1e-18, %v314_v54 }
 0x1a1   : > { %393 = vrsqrt.f32 %v315_v55  ;;  %vm318_vm3 = vcmp.eq.f32.partialorder %v315_v55, inf  ;;  %v321_v58 = vand.u32 2147483648, %v315_v55  ;;  %vm320_vm4 = vcmp.eq.f32.partialorder %v315_v55, 0.0 }
 0x1ab   : > { %v394_v56 = vpop.eup %393 }
 0x1ac   : > { %v317_v57 = vmul.f32 %v394_v56, %v315_v55 }
 0x1ae   : > { %v319_v59 = vsel %vm318_vm3, %v315_v55, %v317_v57 }
 0x1af   : > { %v322_v60 = vsel %vm320_vm4, %v321_v58, %v319_v59 }
 0x1b0   : > { %v323_v61 = vsel %vm289_vm1, %v322_v60, 0.0 }
 0x1b1   : > { %330 = vadd.xlane.f32.xlu0 %v323_v61  ;;  %v324_v62 = vrot.slane %v323_v61, 4 }
 0x1b3   : > { %v325_v63 = vadd.f32 %v324_v62, %v323_v61 }
 0x1b5   : > { %v326_v0 = vrot.slane %v325_v63, 2 }
 0x1b7   : > { %v327_v1 = vadd.f32 %v326_v0, %v325_v63 }
 0x1b9   : > { %v328_v2 = vrot.slane %v327_v1, 1 }
 0x1bb   : > { %v329_v3 = vadd.f32 %v328_v2, %v327_v1 }
 0x1bd   : > { %v338_v4 = vmul.f32 0.16666667, %v329_v3 }
 0x1bf   : > { %v339_v5 = vsub.f32 %v322_v60, %v338_v4 }
 0x23e   : > { %v331_v6 = vpop.xlane.xlu0 %330 }
 0x23f   : > { %v332_v7 = vrot.slane %v331_v6, 4  ;;  %v340_v12 = vmul.f32 0.16666667, %v331_v6 }
 0x241   : > { %v333_v8 = vadd.f32 %v332_v7, %v331_v6  ;;  %v341_v14 = vsub.f32 %v339_v5, %v340_v12 }
 0x243   : > { %v334_v9 = vrot.slane %v333_v8, 2 }
 0x245   : > { %v335_v10 = vadd.f32 %v334_v9, %v333_v8 }
 0x247   : > { %v336_v11 = vrot.slane %v335_v10, 1 }
 0x249   : > { %v337_v13 = vadd.f32 %v336_v11, %v335_v10 }
 0x24b   : > { %v342_v15 = vmul.f32 0.023809524, %v337_v13 }
 0x24d   : > { %v343_v16 = vadd.f32 %v342_v15, %v341_v14 }
 0x24f   : > { %v344_v17 = vsel %vm300_vm2, 0.0, %v343_v16 }
 0x250   : > { %345 = vst.msk [vmem:[%s443_s1] sm:$0xff] %vm289_vm1, %v344_v17 }
 0x251 PF: > { %s11_s6 = sadd.s32 1, %s401_s6  }
 0x252   : > { %p8_p6 = scmp.ge.s32.totalorder %s11_s6, 4  }
 0x254   :  { %10 = sbr.rel (!%p8_p6) target bundleno = 1 (0x1), region = 58 }

// kernel: loss_dc_forward.7
= control target key start
LH: loop header
LB: loop body
LE: loop exit
PB: predicated region body
PF: predicated region fallthrough
CT: control target
= control target key end

     0   :  { %13 = vsyncpa [#allocation3], 0  ;;  %vm63_vm0 = vcmask 64512   ;;  %vm26_vm1 = vcmask 261120   ;;  %v257_v6 = vmov 0   ;;  %s383_s0 = inlined_call_operand.vmem [shape: f32[8,32], index: 0, kind: input, shape index: {}]   ;;  %s384_s1 = inlined_call_operand.vmem [shape: s32[8,1], index: 1, kind: input, shape index: {}]   ;;  %s385_s2 = inlined_call_operand.vmem [shape: f32[8,8], index: 2, kind: input, shape index: {}]   ;;  %s386_s3 = inlined_call_operand.vmem [shape: f32[8,8], index: 3, kind: input, shape index: {}]   ;;  %s387_s4 = inlined_call_operand.vmem [shape: f32[8,8], index: 4, kind: input, shape index: {}]   ;;  %s388_s5 = inlined_call_operand.hbm [shape: f32[1,1], index: 5, kind: output, shape index: {0}]   ;;  %s389_s6 = inlined_call_operand.hbm [shape: f32[1,1], index: 6, kind: output, shape index: {1}]   ;;  %s390_s7 = inlined_call_operand.hbm [shape: f32[1,1], index: 7, kind: output, shape index: {2}]  }
   0x1   :  { %v60_v0 = vld [vmem:[%s386_s3] sm:$0xff]  ;;  %177 = vset.pattern.permute.xlu1 %v257_v6 }
   0x2   :  { %v59_v1 = vld [vmem:[%s385_s2] sm:$0xff]  ;;  %v74_v3 = vmul.f32 %v60_v0, %v60_v0 }
   0x3   :  { %v25_v2 = vld [vmem:[%s383_s0] sm:$0xff]  ;;  %v62_v4 = vmul.f32 %v60_v0, %v59_v1 }
   0x4   :  { %v27_v5 = vsel %vm26_vm1, %v25_v2, -inf }
   0x5   :  { %14 = vsyncpa [#allocation5], 0  ;;  %178 = vset.pattern.permute.xlu0 %v257_v6  ;;  %28 = vmax.xlane.f32.xlu1 %v27_v5  ;;  %v75_v7 = vsel %vm63_vm0, %v74_v3, 0.0  ;;  %v64_v8 = vsel %vm63_vm0, %v62_v4, 0.0  ;;  %v41_v9 = vld [vmem:[%s384_s1] sm:$0xff]  ;;  %v39_v13 = vlaneseq  ;;  %vm126_vm3 = vcmask 0  }
   0x6   :  { %76 = vadd.xlane.f32.xlu0 %v75_v7  ;;  %v61_v10 = vld [vmem:[%s387_s4] sm:$0xff]  ;;  %s258_s1 = smov [#allocation4]   ;;  %s259_s8 = smov [#allocation6]  }
   0x7   :  { %v111_v11 = vmul.f32 %v61_v10, %v61_v10  ;;  %v40_v15 = vand.u32 127, %v39_v13  ;;  %s148_s4 = sshll.u32 %s258_s1, 4  ;;  %s158_s9 = sshll.u32 %s259_s8, 4  ;;  %s149_s4 = int_to_ptr.vmem [resolvable:$true] %s148_s4  ;;  %s329_s9 = int_to_ptr.vmem [resolvable:$true] %s158_s9 }
   0x8   :  { %s260_s10 = smov [#allocation2]   ;;  %s187_s12 = scalar_lea.vmem %s149_s4, 16 }
   0x9   :  { %v112_v12 = vsel %vm63_vm0, %v111_v11, 0.0  ;;  %s138_s11 = sshll.u32 %s260_s10, 4  ;;  %p188_p0 = scmp.ne.s32.totalorder %s149_s4, %s187_s12  ;;  %s332_s11 = int_to_ptr.vmem [resolvable:$true] %s138_s11 }
   0xa   :  { %65 = vadd.xlane.f32.xlu0 %v64_v8  ;;  %s191_s13 = scalar_lea.vmem %s149_s4, 32  ;;  %p192_p1 = scmp.lt.s32.totalorder %s149_s4, %s149_s4 }
   0xb   :  { %p193_p2 = scmp.lt.s32.totalorder %s191_s13, %s187_s12 }
   0xd   :  { %p194_p3 = por %p193_p2, %p192_p1 }
   0xe   :  { %113 = vadd.xlane.f32.xlu0 %v112_v12 }
   0xf   :  { %p195_p4 = pnand %p194_p3, %p188_p0 }
  0x16   :  { %43 = vperm.xlu1 %177, %v41_v9  }
  0x92   :  { %v320_v14 = vpop.xlane.xlu1 %28 }
  0x93   :  { %v77_v16 = vpop.xlane.xlu0 %76  ;;  %v30_v32 = vsub.f32 %v25_v2, %v320_v14 }
  0x94   :  { %v78_v17 = vrot.slane %v77_v16, 4 }
  0x95   :  { %v31_v34 = vmul.f32 1.442695, %v30_v32 }
  0x96   :  { %v44_v18 = vpop.permute.xlu1 %43  ;;  %v79_v19 = vadd.f32 %v78_v17, %v77_v16 }
  0x97   :  { %vm45_vm2 = vcmp.eq.s32.totalorder %v40_v15, %v44_v18  ;;  %v66_v20 = vpop.xlane.xlu0 %65 }
  0x98   :  { %v46_v21 = vsel %vm45_vm2, %v25_v2, 0.0  ;;  %v80_v22 = vrot.slane %v79_v19, 2  ;;  %v67_v23 = vrot.slane %v66_v20, 4 }
  0x99   :  { %v47_v24 = vsel %vm26_vm1, %v46_v21, 0.0 }
  0x9a   :  { %48 = vadd.xlane.f32.xlu1 %v47_v24  ;;  %v81_v25 = vadd.f32 %v80_v22, %v79_v19  ;;  %v68_v26 = vadd.f32 %v67_v23, %v66_v20 }
  0x9b   :  { %v114_v47 = vpop.xlane.xlu0 %113 }
  0x9c   :  { %v82_v27 = vrot.slane %v81_v25, 1  ;;  %v69_v28 = vrot.slane %v68_v26, 2  ;;  %v115_v48 = vrot.slane %v114_v47, 4 }
  0x9e   :  { %v83_v29 = vadd.f32 %v82_v27, %v81_v25  ;;  %v70_v30 = vadd.f32 %v69_v28, %v68_v26  ;;  %v116_v49 = vadd.f32 %v115_v48, %v114_v47 }
  0xa0   :  { %v84_v31 = vmul.f32 0.025, %v83_v29  ;;  %v71_v33 = vrot.slane %v70_v30, 1  ;;  %v117_v50 = vrot.slane %v116_v49, 2 }
  0xa2   :  { %179 = vrcp.f32 %v84_v31  ;;  %v72_v35 = vadd.f32 %v71_v33, %v70_v30  ;;  %v118_v52 = vadd.f32 %v117_v50, %v116_v49 }
  0xa3   :  { %181 = vpow2.f32 %v31_v34 }
  0xa4   :  { %v73_v36 = vmul.f32 0.025, %v72_v35  ;;  %v119_v56 = vrot.slane %v118_v52, 1 }
  0xa6   :  { %v120_v60 = vadd.f32 %v119_v56, %v118_v52 }
  0xac   :  { %v180_v37 = vpop.eup %179 }
  0xad   :  { %v86_v38 = vmul.f32 %v180_v37, %v73_v36  ;;  %v182_v42 = vpop.eup %181 }
  0xae   :  { %v33_v44 = vsel %vm26_vm1, %v182_v42, 0.0 }
  0xaf   :  { %v87_v39 = vmul.f32 %v86_v38, %v60_v0 }
  0xb1   :  { %v88_v40 = vsub.f32 %v59_v1, %v87_v39  ;;  %v121_v1 = vmul.f32 0.025, %v120_v60 }
  0xb3   :  { %v100_v41 = vmul.f32 %v88_v40, %v88_v40  ;;  %v89_v45 = vmul.f32 %v88_v40, %v61_v10 }
  0xb5   :  { %v101_v43 = vsel %vm63_vm0, %v100_v41, 0.0  ;;  %v90_v46 = vsel %vm63_vm0, %v89_v45, 0.0 }
  0xb6   :  { %102 = vadd.xlane.f32.xlu0 %v101_v43 }
  0xba   :  { %34 = vadd.xlane.f32.xlu0 %v33_v44 }
  0xbe   :  { %91 = vadd.xlane.f32.xlu0 %v90_v46 }
 0x127   :  { %v49_v9 = vpop.xlane.xlu1 %48 }
 0x143   :  { %v103_v51 = vpop.xlane.xlu0 %102 }
 0x144   :  { %v104_v53 = vrot.slane %v103_v51, 4 }
 0x146   :  { %v105_v54 = vadd.f32 %v104_v53, %v103_v51 }
 0x147   :  { %v35_v55 = vpop.xlane.xlu0 %34 }
 0x148   :  { %v106_v57 = vrot.slane %v105_v54, 2  ;;  %183 = vlog2.f32 %v35_v55 }
 0x14a   :  { %v107_v58 = vadd.f32 %v106_v57, %v105_v54 }
 0x14b   :  { %v92_v59 = vpop.xlane.xlu0 %91 }
 0x14c   :  { %v108_v61 = vrot.slane %v107_v58, 1  ;;  %v93_v62 = vrot.slane %v92_v59, 4 }
 0x14e   :  { %v109_v63 = vadd.f32 %v108_v61, %v107_v58  ;;  %v94_v0 = vadd.f32 %v93_v62, %v92_v59 }
 0x150   :  { %v110_v2 = vmul.f32 0.025, %v109_v63  ;;  %v95_v3 = vrot.slane %v94_v0, 2 }
 0x152   :  { %v184_v4 = vpop.eup %183  ;;  %v122_v5 = vmul.f32 %v121_v1, %v110_v2  ;;  %v96_v7 = vadd.f32 %v95_v3, %v94_v0 }
 0x153   :  { %v37_v6 = vmul.f32 0.6931472, %v184_v4 }
 0x154   :  { %v123_v8 = vadd.f32 1e-18, %v122_v5  ;;  %v97_v11 = vrot.slane %v96_v7, 1 }
 0x155   :  { %v38_v10 = vadd.f32 %v37_v6, %v320_v14 }
 0x156   :  { %185 = vrsqrt.f32 %v123_v8  ;;  %v98_v15 = vadd.f32 %v97_v11, %v96_v7 }
 0x157   :  { %v50_v12 = vsub.f32 %v38_v10, %v49_v9 }
 0x158   :  { %v99_v18 = vmul.f32 0.025, %v98_v15 }
 0x159   :  { %v52_v13 = vrot.slane %v50_v12, 4 }
 0x15b   :  { %v53_v16 = vadd.f32 %v52_v13, %v50_v12 }
 0x15d   :  { %v54_v17 = vrot.slane %v53_v16, 2 }
 0x15f   :  { %v55_v19 = vadd.f32 %v54_v17, %v53_v16 }
 0x160   :  { %v186_v20 = vpop.eup %185 }
 0x161   :  { %v56_v21 = vrot.slane %v55_v19, 1  ;;  %v125_v22 = vmul.f32 %v186_v20, %v99_v18 }
 0x163   :  { %v57_v23 = vadd.f32 %v56_v21, %v55_v19  ;;  %128 = vst.msk [vmem:[#allocation6] sm:$0x1] %vm126_vm3, %v125_v22  ;;  %v129_v24 = vmul.f32 0.1, %v125_v22 }
 0x165   :  { %v58_v14 = vmul.f32 0.125, %v57_v23 }
 0x167   :  { %127 = vst.msk [vmem:[#allocation4] sm:$0x1] %vm126_vm3, %v58_v14  ;;  %v130_v25 = vsub.f32 %v58_v14, %v129_v24 }
 0x168   :  { %198 = shalt.err (!%p195_p4)
}
 0x169   :  { %s199_s16 = scalar_lea.hbm %s389_s6, 16 }
 0x16a   :  { %p200_p5 = scmp.ne.s32.totalorder %s389_s6, %s199_s16  ;;  %p203_p6 = scmp.lt.u32.totalorder %s199_s16, %s389_s6 }
 0x16c   :  { %p205_p7 = pnand %p203_p6, %p200_p5 }
 0x16e   :  { %208 = shalt.err (!%p205_p7)
}
 0x16f   :  { %151 = dma.vmem_to_hbm [thread:$0]  %s149_s4, 16, %s389_s6, [#allocation5]   ;;  %131 = vst.msk [vmem:[#allocation2] sm:$0x1] %vm126_vm3, %v130_v25 }
 0x170   :  { %s209_s23 = scalar_lea.vmem %s329_s9, 16  ;;  %s213_s24 = scalar_lea.vmem %s329_s9, 32 }
 0x171   :  { %p210_p8 = scmp.ne.s32.totalorder %s329_s9, %s209_s23  ;;  %p214_p9 = scmp.lt.s32.totalorder %s329_s9, %s329_s9 }
 0x172   :  { %p215_p10 = scmp.lt.s32.totalorder %s213_s24, %s209_s23 }
 0x174   :  { %p216_p11 = por %p215_p10, %p214_p9 }
 0x176   :  { %p217_p12 = pnand %p216_p11, %p210_p8 }
 0x178   :  { %220 = shalt.err (!%p217_p12)
}
 0x179   :  { %s221_s27 = scalar_lea.hbm %s390_s7, 16 }
 0x17a   :  { %p222_p13 = scmp.ne.s32.totalorder %s390_s7, %s221_s27  ;;  %p225_p0 = scmp.lt.u32.totalorder %s221_s27, %s390_s7 }
 0x17c   :  { %p227_p1 = pnand %p225_p0, %p222_p13 }
 0x17e   :  { %230 = shalt.err (!%p227_p1)
}
 0x17f   :  { %161 = dma.vmem_to_hbm [thread:$0]  %s329_s9, 16, %s390_s7, [#allocation5]  }
 0x180   :  { %s231_s30 = scalar_lea.vmem %s332_s11, 16  ;;  %s235_s1 = scalar_lea.vmem %s332_s11, 32 }
 0x181   :  { %p232_p2 = scmp.ne.s32.totalorder %s332_s11, %s231_s30  ;;  %p236_p3 = scmp.lt.s32.totalorder %s332_s11, %s332_s11 }
 0x182   :  { %p237_p4 = scmp.lt.s32.totalorder %s235_s1, %s231_s30 }
 0x184   :  { %p238_p5 = por %p237_p4, %p236_p3 }
 0x186   :  { %p239_p6 = pnand %p238_p5, %p232_p2 }
 0x188   :  { %242 = shalt.err (!%p239_p6)
}
 0x189   :  { %s243_s10 = scalar_lea.hbm %s388_s5, 16 }
 0x18a   :  { %p244_p7 = scmp.ne.s32.totalorder %s388_s5, %s243_s10  ;;  %p247_p8 = scmp.lt.u32.totalorder %s243_s10, %s388_s5 }
 0x18c   :  { %p249_p9 = pnand %p247_p8, %p244_p7 }
 0x18e   :  { %252 = shalt.err (!%p249_p9)
}
 0x18f   :  { %141 = dma.vmem_to_hbm [thread:$0]  %s332_s11, 16, %s388_s5, [#allocation3]  }
 0x190   :  { %253 = dma.done.wait [#allocation3], 16  }
 0x191   :  { %254 = vsyncadd [#allocation3], 4294967280 }
 0x192   :  { %255 = dma.done.wait [#allocation5], 32  }
 0x193   :  { %256 = vsyncadd [#allocation5], 4294967264 }
 0x194   :  { %171 = vsyncpa [#allocation3], 1 }
 0x195   :  { %172 = vsyncpa [#allocation5], 1 }

</bundles_post_ra>
